<compile_context>
chip_gen: v7x
topology: tpu7x:2x2x1
jax: 0.10.0
libtpu: 0.0.40
codegen_flags: <defaults>
</compile_context>

<pallas_src>
import functools

import jax
import jax.numpy as jnp
from jax.experimental import pallas as pl
from jax.experimental.pallas import tpu as pltpu


def _l1_partial_sum_kernel(preds_ref, labels_ref, out_ref, acc_ref, *,
                           n_rows, n_cols, tile_rows, tile_cols,
                           blocks_per_shard, needs_row_mask, needs_col_mask):
    c = pl.program_id(0)   # row shard ("parallel": maps to TensorCores on v7x)
    j = pl.program_id(1)   # column block ("arbitrary")
    i = pl.program_id(2)   # row block within the shard ("arbitrary")

    @pl.when(jnp.logical_and(j == 0, i == 0))
    def _():
        acc_ref[...] = jnp.zeros_like(acc_ref)

    diff = preds_ref[...].astype(jnp.float32) - labels_ref[...].astype(jnp.float32)
    absdiff = jnp.abs(diff)

    if needs_row_mask:
        # Zero out rows past the true row count (padded last tile and/or the
        # duplicated, clamped trailing block on the second shard).
        row_start = (c * blocks_per_shard + i) * tile_rows
        row_ids = row_start + jax.lax.broadcasted_iota(jnp.int32, absdiff.shape, 0)
        absdiff = jnp.where(row_ids < n_rows, absdiff, 0.0)
    if needs_col_mask:
        # Zero out lanes past the true column count (ragged last column block).
        col_start = j * tile_cols
        col_ids = col_start + jax.lax.broadcasted_iota(jnp.int32, absdiff.shape, 1)
        absdiff = jnp.where(col_ids < n_cols, absdiff, 0.0)

    # Reduce (tile_rows, tn) -> (8, tn): summing 8-row groups is plain
    # vreg-to-vreg VPU adds; the expensive cross-lane reduce is deferred.
    tm, tn = absdiff.shape
    acc_ref[...] += absdiff.reshape(tm // 8, 8, tn).sum(axis=0)

    @pl.when(jnp.logical_and(j == pl.num_programs(1) - 1,
                             i == pl.num_programs(2) - 1))
    def _():
        out_ref[0, 0] = jnp.sum(acc_ref[...])


def l1_loss(preds, labels, *, target_block_bytes=2 * 1024 * 1024):
    """Mean absolute error over 2-D inputs (== torch.nn.L1Loss() default)."""
    assert preds.ndim == 2 and labels.ndim == 2
    assert preds.shape == labels.shape
    M, N = preds.shape
    itemsize = jnp.dtype(preds.dtype).itemsize

    # Sublane packing granularity: 8 (4-byte), 16 (2-byte), 32 (1-byte) dtypes.
    sub = {4: 8, 2: 16, 1: 32}.get(itemsize, 8)
    lane = 128

    # --- Column tile: full N unless a single sub-row-group would exceed the
    # per-block budget, in which case tile columns in multiples of 128. -------
    if N <= lane or N * itemsize * sub <= target_block_bytes:
        tn = N
    else:
        tn = max(lane, (target_block_bytes // (itemsize * sub)) // lane * lane)
        if tn >= N:
            tn = N
    n_col_blocks = pl.cdiv(N, tn)
    needs_col_mask = (N % tn) != 0

    # --- Row tile: ~target_block_bytes per input block, multiple of `sub`. ---
    m_pad = ((M + sub - 1) // sub) * sub
    tm = min(m_pad, max(sub, (target_block_bytes // (tn * itemsize)) // sub * sub))

    total_row_blocks = pl.cdiv(M, tm)
    num_shards = 2 if total_row_blocks >= 2 else 1       # 2 TensorCores on v7x
    blocks_per_shard = pl.cdiv(total_row_blocks, num_shards)
    needs_row_mask = (M % tm != 0) or (num_shards * blocks_per_shard != total_row_blocks)
    last_row_block = total_row_blocks - 1

    def in_index_map(c, j, i):
        # Clamp so the duplicated trailing step of the second shard re-reads a
        # valid block (its contribution is masked to zero inside the kernel).
        blk = jnp.minimum(c * blocks_per_shard + i, last_row_block)
        return (blk, j)

    kernel = functools.partial(
        _l1_partial_sum_kernel,
        n_rows=M,
        n_cols=N,
        tile_rows=tm,
        tile_cols=tn,
        blocks_per_shard=blocks_per_shard,
        needs_row_mask=needs_row_mask,
        needs_col_mask=needs_col_mask,
    )

    partials = pl.pallas_call(
        kernel,
        out_shape=jax.ShapeDtypeStruct((num_shards, 1), jnp.float32),
        grid_spec=pltpu.PrefetchScalarGridSpec(
            num_scalar_prefetch=0,
            grid=(num_shards, n_col_blocks, blocks_per_shard),
            in_specs=[
                pl.BlockSpec((tm, tn), in_index_map),
                pl.BlockSpec((tm, tn), in_index_map),
            ],
            out_specs=pl.BlockSpec((1, 1), lambda c, j, i: (c, 0),
                                   memory_space=pltpu.SMEM),
            scratch_shapes=[pltpu.VMEM((8, tn), jnp.float32)],
        ),
        compiler_params=pltpu.CompilerParams(
            dimension_semantics=("parallel", "arbitrary", "arbitrary"),
            vmem_limit_bytes=32 * 1024 * 1024,
        ),
    )(preds, labels)

    # 'mean' reduction: divide by the true element count in the wrapper.
    return jnp.sum(partials) / jnp.float32(M * N)


if __name__ == "__main__":
    key = jax.random.PRNGKey(0)
    k1, k2 = jax.random.split(key)

    # Main test: 2-D inputs as required by the module's forward().
    preds = jax.random.normal(k1, (16, 128), dtype=jnp.float32)
    labels = jax.random.normal(k2, (16, 128), dtype=jnp.float32)
    loss = l1_loss(preds, labels)
    jax.block_until_ready(loss)
    ref = jnp.mean(jnp.abs(preds - labels))
    assert jnp.allclose(loss, ref, rtol=1e-6, atol=1e-6), (loss, ref)

    # Non-divisible row count -> exercises the masked partial row tile.
    p2 = jax.random.normal(k1, (37, 128), dtype=jnp.float32)
    l2 = jax.random.normal(k2, (37, 128), dtype=jnp.float32)
    loss2 = l1_loss(p2, l2)
    jax.block_until_ready(loss2)
    ref2 = jnp.mean(jnp.abs(p2 - l2))
    assert jnp.allclose(loss2, ref2, rtol=1e-5, atol=1e-6), (loss2, ref2)

    # Multi-block 2-shard path + forced column tiling with ragged last column
    # block (small target_block_bytes -> tn=256 over N=384, tm=8 over M=300).
    p3 = jax.random.normal(k1, (300, 384), dtype=jnp.float32)
    l3 = jax.random.normal(k2, (300, 384), dtype=jnp.float32)
    loss3 = l1_loss(p3, l3, target_block_bytes=8 * 1024)
    jax.block_until_ready(loss3)
    ref3 = jnp.mean(jnp.abs(p3 - l3))
    assert jnp.allclose(loss3, ref3, rtol=1e-5, atol=1e-6), (loss3, ref3)

    print("KERNEL_OK")
</pallas_src>

<mosaic_0001>
module attributes {stable_mosaic.version = 11 : i64} {
  func.func @_l1_partial_sum_kernel(%arg0: i32, %arg1: i32, %arg2: i32, %arg3: memref<16x128xf32, #tpu.memory_space<vmem>>, %arg4: memref<16x128xf32, #tpu.memory_space<vmem>>, %arg5: memref<1x1xf32, #tpu.memory_space<smem>>, %arg6: memref<8x128xf32, #tpu.memory_space<vmem>>) attributes {dimension_semantics = [#tpu.dimension_semantics<parallel>, #tpu.dimension_semantics<arbitrary>, #tpu.dimension_semantics<arbitrary>], iteration_bounds = array<i64: 1, 1, 1>, scalar_prefetch = 0 : i64, scratch_operands = 1 : i64, tpu.core_type = #tpu.core_type<tc>, window_params = [{transform_indices = @transform_0, window_bounds = array<i64: 16, 128>}, {transform_indices = @transform_1, window_bounds = array<i64: 16, 128>}, {transform_indices = @transform_2, window_bounds = array<i64: 1, 1>}]} {
    %c0_i32 = arith.constant 0 : i32
    %0 = arith.cmpi eq, %arg1, %c0_i32 : i32
    %c0_i32_0 = arith.constant 0 : i32
    %1 = arith.cmpi eq, %arg2, %c0_i32_0 : i32
    %2 = arith.andi %0, %1 : i1
    %3 = arith.extui %2 : i1 to i32
    %c0_i32_1 = arith.constant 0 : i32
    %4 = arith.cmpi ne, %3, %c0_i32_1 : i32
    scf.if %4 {
      %cst_12 = arith.constant 0.000000e+00 : f32
      %19 = vector.broadcast %cst_12 : f32 to vector<8x128xf32>
      %c0_13 = arith.constant 0 : index
      %c0_14 = arith.constant 0 : index
      %20 = vector.load %arg6[%c0_13, %c0_14] : memref<8x128xf32, #tpu.memory_space<vmem>>, vector<8x128xf32>
      tpu.vector_store %arg6[%c0_13, %c0_14], %19 {strides = array<i32>} : memref<8x128xf32, #tpu.memory_space<vmem>>, vector<8x128xf32>,
    } else {
    }
    %c0 = arith.constant 0 : index
    %c0_2 = arith.constant 0 : index
    %5 = vector.load %arg3[%c0, %c0_2] : memref<16x128xf32, #tpu.memory_space<vmem>>, vector<16x128xf32>
    %c0_3 = arith.constant 0 : index
    %c0_4 = arith.constant 0 : index
    %6 = vector.load %arg4[%c0_3, %c0_4] : memref<16x128xf32, #tpu.memory_space<vmem>>, vector<16x128xf32>
    %7 = arith.subf %5, %6 : vector<16x128xf32>
    %8 = math.absf %7 : vector<16x128xf32>
    %c0_5 = arith.constant 0 : index
    %c0_6 = arith.constant 0 : index
    %9 = vector.load %arg6[%c0_5, %c0_6] : memref<8x128xf32, #tpu.memory_space<vmem>>, vector<8x128xf32>
    %10 = vector.shape_cast %8 : vector<16x128xf32> to vector<2x8x128xf32>
    %cst = arith.constant dense<0.000000e+00> : vector<8x128xf32>
    %11 = vector.multi_reduction <add>, %10, %cst [0] : vector<2x8x128xf32> to vector<8x128xf32>
    %12 = arith.addf %9, %11 : vector<8x128xf32>
    %c0_7 = arith.constant 0 : index
    %c0_8 = arith.constant 0 : index
    %13 = vector.load %arg6[%c0_7, %c0_8] : memref<8x128xf32, #tpu.memory_space<vmem>>, vector<8x128xf32>
    tpu.vector_store %arg6[%c0_7, %c0_8], %12 {strides = array<i32>} : memref<8x128xf32, #tpu.memory_space<vmem>>, vector<8x128xf32>,
    %c0_i32_9 = arith.constant 0 : i32
    %14 = arith.cmpi eq, %arg1, %c0_i32_9 : i32
    %c0_i32_10 = arith.constant 0 : i32
    %15 = arith.cmpi eq, %arg2, %c0_i32_10 : i32
    %16 = arith.andi %14, %15 : i1
    %17 = arith.extui %16 : i1 to i32
    %c0_i32_11 = arith.constant 0 : i32
    %18 = arith.cmpi ne, %17, %c0_i32_11 : i32
    scf.if %18 {
      %c0_12 = arith.constant 0 : index
      %c0_13 = arith.constant 0 : index
      %19 = vector.load %arg6[%c0_12, %c0_13] : memref<8x128xf32, #tpu.memory_space<vmem>>, vector<8x128xf32>
      %20 = vector.shape_cast %19 : vector<8x128xf32> to vector<1x8x128xf32>
      %cst_14 = arith.constant dense<0.000000e+00> : vector<1xf32>
      %21 = vector.multi_reduction <add>, %20, %cst_14 [1, 2] : vector<1x8x128xf32> to vector<1xf32>
      %22 = vector.shape_cast %21 : vector<1xf32> to vector<1x1x1xf32>
      %23 = vector.extract %22[0, 0, 0] : f32 from vector<1x1x1xf32>
      %c0_15 = arith.constant 0 : index
      %c0_16 = arith.constant 0 : index
      %24 = memref.load %arg5[%c0_15, %c0_16] : memref<1x1xf32, #tpu.memory_space<smem>>
      memref.store %23, %arg5[%c0_15, %c0_16] : memref<1x1xf32, #tpu.memory_space<smem>>
    } else {
    }
    return
  }
  func.func @transform_0(%arg0: i32, %arg1: i32, %arg2: i32) -> (i32, i32) {
    %c1_i32 = arith.constant 1 : i32
    %0 = arith.muli %arg0, %c1_i32 : i32
    %1 = arith.addi %0, %arg2 : i32
    %c0_i32 = arith.constant 0 : i32
    %2 = arith.minsi %1, %c0_i32 : i32
    %c0_i32_0 = arith.constant 0 : i32
    return %2, %arg1 : i32, i32
  }
  func.func @transform_1(%arg0: i32, %arg1: i32, %arg2: i32) -> (i32, i32) {
    %c1_i32 = arith.constant 1 : i32
    %0 = arith.muli %arg0, %c1_i32 : i32
    %1 = arith.addi %0, %arg2 : i32
    %c0_i32 = arith.constant 0 : i32
    %2 = arith.minsi %1, %c0_i32 : i32
    %c0_i32_0 = arith.constant 0 : i32
    return %2, %arg1 : i32, i32
  }
  func.func @transform_2(%arg0: i32, %arg1: i32, %arg2: i32) -> (i32, i32) {
    %c0_i32 = arith.constant 0 : i32
    %c0_i32_0 = arith.constant 0 : i32
    return %arg0, %c0_i32 : i32, i32
  }
}

</mosaic_0001>

<bundles_post_ra>
// kernel: tpu_custom_call.1
= control target key start
LH: loop header
LB: loop body
LE: loop exit
PB: predicated region body
PF: predicated region fallthrough
CT: control target
= control target key end

     0   :  { %7 = vsyncpa [#allocation4], 0  ;;  %s235_s0 = inlined_call_operand.hbm [shape: f32[16,128], index: 0, kind: input, shape index: {}]   ;;  %s236_s1 = inlined_call_operand.hbm [shape: f32[16,128], index: 1, kind: input, shape index: {}]   ;;  %s237_s2 = inlined_call_operand.hbm [shape: f32[1,1], index: 2, kind: output, shape index: {}]  }
   0x1   :  { %8 = vsyncpa [#allocation7], 0 }
   0x2   :  { %9 = vsyncpa [#allocation5], 0  ;;  %s179_s9 = smov [#allocation3]   ;;  %s119_s13 = scalar_lea.hbm %s235_s0, 256 }
   0x3   :  { %s21_s10 = sshll.u32 %s179_s9, 4  ;;  %p120_p0 = scmp.ne.s32.totalorder %s235_s0, %s119_s13  ;;  %s22_s10 = int_to_ptr.vmem [resolvable:$true] %s21_s10 }
   0x4   :  { %p123_p1 = scmp.lt.u32.totalorder %s119_s13, %s235_s0 }
   0x6   :  { %p125_p2 = pnand %p123_p1, %p120_p0 }
   0x8   :  { %128 = shalt.err (!%p125_p2)
}
   0x9   :  { %s129_s18 = scalar_lea.vmem %s22_s10, 256  ;;  %p134_p4 = scmp.lt.s32.totalorder %s22_s10, %s22_s10 }
   0xa   :  { %p130_p3 = scmp.ne.s32.totalorder %s22_s10, %s129_s18  ;;  %p135_p5 = scmp.lt.s32.totalorder %s129_s18, %s129_s18 }
   0xc   :  { %p136_p6 = por %p135_p5, %p134_p4 }
   0xe   :  { %p137_p7 = pnand %p136_p6, %p130_p3 }
  0x10   :  { %140 = shalt.err (!%p137_p7)
}
  0x11   :  { %s180_s19 = smov 128   ;;  %s181_s20 = smov 8  }
  0x12   :  { %27 = dma.hbm_to_vmem [thread:$0]  %s235_s0, 256, %s22_s10, [#allocation4], %s180_s19, %s180_s19, %s181_s20  }
  0x13   :  { %s182_s23 = smov [#allocation6]   ;;  %s141_s27 = scalar_lea.hbm %s236_s1, 256 }
  0x14   :  { %s39_s24 = sshll.u32 %s182_s23, 4  ;;  %p142_p8 = scmp.ne.s32.totalorder %s236_s1, %s141_s27  ;;  %s40_s24 = int_to_ptr.vmem [resolvable:$true] %s39_s24 }
  0x15   :  { %p145_p9 = scmp.lt.u32.totalorder %s141_s27, %s236_s1 }
  0x17   :  { %p147_p10 = pnand %p145_p9, %p142_p8 }
  0x19   :  { %150 = shalt.err (!%p147_p10)
}
  0x1a   :  { %s151_s4 = scalar_lea.vmem %s40_s24, 256  ;;  %p156_p12 = scmp.lt.s32.totalorder %s40_s24, %s40_s24 }
  0x1b   :  { %p152_p11 = scmp.ne.s32.totalorder %s40_s24, %s151_s4  ;;  %p157_p13 = scmp.lt.s32.totalorder %s151_s4, %s151_s4 }
  0x1d   :  { %p158_p0 = por %p157_p13, %p156_p12 }
  0x1f   :  { %p159_p1 = pnand %p158_p0, %p152_p11 }
  0x21   :  { %162 = shalt.err (!%p159_p1)
}
  0x22   :  { %45 = dma.hbm_to_vmem [thread:$0]  %s236_s1, 256, %s40_s24, [#allocation7], %s180_s19, %s180_s19, %s181_s20  }
  0x23   :  { %173 = dma.done.wait [#allocation4], 256  }
  0x24   :  { %174 = vsyncadd [#allocation4], 4294967040 }
  0x25   :  { %175 = dma.done.wait [#allocation7], 256  }
  0x26   :  { %176 = vsyncadd [#allocation7], 4294967040  ;;  %v67_v0 = vld [vmem:[#allocation3] sm:$0xff]  ;;  %v68_v1 = vld [vmem:[#allocation3 + $0x8] sm:$0xff]  ;;  %s163_s8 = scalar_lea.hbm %s237_s2, 16 }
  0x27   :  { %v69_v2 = vld [vmem:[#allocation6] sm:$0xff]  ;;  %v70_v3 = vld [vmem:[#allocation6 + $0x8] sm:$0xff]  ;;  %p164_p2 = scmp.ne.s32.totalorder %s237_s2, %s163_s8  ;;  %p167_p3 = scmp.lt.u32.totalorder %s163_s8, %s237_s2 }
  0x28   :  { %v71_v4 = vsub.f32 %v67_v0, %v69_v2  ;;  %v72_v5 = vsub.f32 %v68_v1, %v70_v3 }
  0x29   :  { %p169_p4 = pnand %p167_p3, %p164_p2 }
  0x2a   :  { %v73_v6 = vand.u32 2147483647, %v71_v4  ;;  %v74_v7 = vand.u32 2147483647, %v72_v5 }
  0x2c   :  { %v76_v8 = vadd.f32 %v74_v7, %v73_v6 }
  0x2e   :  { %82 = vadd.xlane.f32.xlu0 %v76_v8 }
  0xbb   :  { %v83_v9 = vpop.xlane.xlu0 %82 }
  0xbc   :  { %v84_v10 = vrot.slane %v83_v9, 4 }
  0xbe   :  { %v85_v11 = vadd.f32 %v84_v10, %v83_v9 }
  0xc0   :  { %v86_v12 = vrot.slane %v85_v11, 2 }
  0xc2   :  { %v87_v13 = vadd.f32 %v86_v12, %v85_v11 }
  0xc4   :  { %v88_v14 = vrot.slane %v87_v13, 1 }
  0xc6   :  { %v89_v15 = vadd.f32 %v88_v14, %v87_v13 }
  0xc8   :  { %112 = vpush %v89_v15 }
  0xf9   :  { %s113_s1 = spop %112 }
  0xfa   :  { %92 = sst [smem:[#allocation8]] %s113_s1 }
  0xfb   :  { %172 = shalt.err (!%p169_p4)
}
  0xfc   :  { %s183_s13 = smov [#allocation8]  }
  0xfd   :  { %100 = dma.smem_to_hbm %s183_s13, 16, %s237_s2, [#allocation5]  }
  0xfe   :  { %177 = dma.done.wait [#allocation5], 16  }
  0xff   :  { %178 = vsyncadd [#allocation5], 4294967280 }
 0x100   :  { %104 = sfence }
 0x101   :  { %105 = vsyncpa [#allocation4], 1 }
 0x102   :  { %106 = vsyncpa [#allocation7], 1 }
 0x103   :  { %107 = vsyncpa [#allocation5], 1 }

</bundles_post_ra>
